<compile_context>
chip_gen: v7x
topology: tpu7x:2x2x1
jax: 0.10.0
libtpu: 0.0.40
codegen_flags: <defaults>
</compile_context>

<pallas_src>
import math
from typing import Iterable, List, Optional, Tuple

import jax
import jax.numpy as jnp
from jax.experimental import pallas as pl
from jax.experimental.pallas import tpu as pltpu

_SUBLANE = 8
_LANE = 128
_BLOCK_BYTES = 1 << 20  # ~1 MiB per block -> 4 MiB live (2 arrays x 2 buffers)


def _copy_kernel(x_ref, o_ref):
    # Identity transform: z = x (full-width vector load/store, no compute).
    o_ref[...] = x_ref[...]


def _choose_slab(total: int) -> Optional[Tuple[int, int]]:
    """Pick a lane/sublane-dense (rows, cols) 2-D view of `total` elements.

    cols is a multiple of 128 (full lane width) and rows a multiple of 8
    (full sublane width) so every vld/vst is unmasked. Returns None if the
    element count does not factor that way.
    """
    for cols in (2048, 1024, 512, 256, 128):
        if total % cols == 0 and (total // cols) % _SUBLANE == 0:
            return total // cols, cols
    return None


def _row_tile(rows: int, cols: int, itemsize: int) -> int:
    """Largest multiple of 8 that divides `rows` with block <= _BLOCK_BYTES."""
    max_tr = max(_SUBLANE,
                 (_BLOCK_BYTES // (cols * itemsize)) // _SUBLANE * _SUBLANE)
    if rows <= max_tr:
        return rows
    units = rows // _SUBLANE
    best = 1
    for k in range(min(units, max_tr // _SUBLANE), 0, -1):
        if units % k == 0:
            best = k
            break
    return best * _SUBLANE


def _tiled_identity_copy(x: jax.Array) -> jax.Array:
    """Identity pass-through of `x` via a tiled, lane-dense Pallas memcpy."""
    total = math.prod(x.shape)
    itemsize = jnp.dtype(x.dtype).itemsize

    slab = _choose_slab(total)
    if slab is None:
        # Fallback: (B, N) view, one full-dims block (bypasses the (8,128)
        # divisibility rule; may use masked stores but remains correct).
        x2d = x.reshape(x.shape[0], -1)
        rows, cols = x2d.shape
        tr = rows
    else:
        rows, cols = slab
        x2d = x.reshape(rows, cols)
        tr = _row_tile(rows, cols, itemsize)

    out2d = pl.pallas_call(
        _copy_kernel,
        out_shape=jax.ShapeDtypeStruct((rows, cols), x2d.dtype),
        grid=(rows // tr,),
        in_specs=[pl.BlockSpec((tr, cols), lambda i: (i, 0))],
        out_specs=pl.BlockSpec((tr, cols), lambda i: (i, 0)),
        compiler_params=pltpu.CompilerParams(
            dimension_semantics=("parallel",),  # v7x: shard rows over both TCs
        ),
    )(x2d)
    return out2d.reshape(x.shape)


class InvertibleModulePallas:
    """JAX/Pallas counterpart of FrEIA's InvertibleModule base class."""

    def __init__(self, dims_in: Iterable[Tuple[int, ...]],
                 dims_c: Iterable[Tuple[int, ...]] = None):
        if dims_c is None:
            dims_c = []
        self.dims_in = list(dims_in)
        self.dims_c = list(dims_c)
        # No learnable parameters in the base class (__init__ only stores dims).

    def forward(self, x_or_z, c=None, rev: bool = False, jac: bool = True):
        # `c` (conditioning) is unused by the parameter-free identity base op.
        outs = []
        batch = None
        for x in x_or_z:
            if batch is None:
                batch = x.shape[0]
            outs.append(_tiled_identity_copy(x))

        # log|det J| of the identity is exactly 0 per batch element; it is
        # trivial, so we return it even when jac=False (allowed by the FrEIA
        # contract) -- produced in the wrapper, never touched by the kernel.
        if batch is None:                      # empty input list guard
            log_jac_det = jnp.zeros((), jnp.float32)
        else:
            log_jac_det = jnp.zeros((batch,), jnp.float32)
        if rev:
            log_jac_det = -log_jac_det         # contract: -J in backward mode

        return tuple(outs), log_jac_det

    __call__ = forward

    def output_dims(self, input_dims: List[Tuple[int, ...]]) -> List[Tuple[int, ...]]:
        # Identity: shapes pass through unchanged.
        return list(input_dims)


if __name__ == "__main__":
    key = jax.random.PRNGKey(0)
    B, C, H, W = 2, 4, 16, 16
    x = jax.random.normal(key, (B, C, H, W), dtype=jnp.float32)

    module = InvertibleModulePallas(dims_in=[(C, H, W)])

    # Forward pass
    (z,), jac_fwd = module([x], jac=True)
    # Backward (rev) pass
    (x_rev,), jac_rev = module([z], rev=True, jac=True)

    jax.block_until_ready((z, jac_fwd, x_rev, jac_rev))

    assert z.shape == x.shape and z.dtype == x.dtype
    assert jac_fwd.shape == (B,)
    assert jnp.allclose(x, z), "identity transform violated"
    assert jnp.allclose(x, x_rev), "invertibility contract violated"
    assert jnp.allclose(jac_fwd, -jac_rev), "jacobian sign contract violated"
    assert module.output_dims([(C, H, W)]) == [(C, H, W)]

    print("KERNEL_OK")
</pallas_src>

<mosaic_0001>
module attributes {stable_mosaic.version = 11 : i64} {
  func.func @_copy_kernel(%arg0: i32, %arg1: memref<8x256xf32, #tpu.memory_space<vmem>>, %arg2: memref<8x256xf32, #tpu.memory_space<vmem>>) attributes {dimension_semantics = [#tpu.dimension_semantics<parallel>], iteration_bounds = array<i64: 1>, scalar_prefetch = 0 : i64, scratch_operands = 0 : i64, tpu.core_type = #tpu.core_type<tc>, window_params = [{transform_indices = @transform_0, window_bounds = array<i64: 8, 256>}, {transform_indices = @transform_1, window_bounds = array<i64: 8, 256>}]} {
    %c0 = arith.constant 0 : index
    %c0_0 = arith.constant 0 : index
    %0 = vector.load %arg1[%c0, %c0_0] : memref<8x256xf32, #tpu.memory_space<vmem>>, vector<8x256xf32>
    %c0_1 = arith.constant 0 : index
    %c0_2 = arith.constant 0 : index
    %1 = vector.load %arg2[%c0_1, %c0_2] : memref<8x256xf32, #tpu.memory_space<vmem>>, vector<8x256xf32>
    tpu.vector_store %arg2[%c0_1, %c0_2], %0 {strides = array<i32>} : memref<8x256xf32, #tpu.memory_space<vmem>>, vector<8x256xf32>,
    return
  }
  func.func @transform_0(%arg0: i32) -> (i32, i32) {
    %c0_i32 = arith.constant 0 : i32
    %c0_i32_0 = arith.constant 0 : i32
    return %arg0, %c0_i32 : i32, i32
  }
  func.func @transform_1(%arg0: i32) -> (i32, i32) {
    %c0_i32 = arith.constant 0 : i32
    %c0_i32_0 = arith.constant 0 : i32
    return %arg0, %c0_i32 : i32, i32
  }
}

</mosaic_0001>

<bundles_post_ra>
// kernel: tpu_custom_call.1
= control target key start
LH: loop header
LB: loop body
LE: loop exit
PB: predicated region body
PF: predicated region fallthrough
CT: control target
= control target key end

     0   :  { %6 = vsyncpa [#allocation3], 0  ;;  %s126_s0 = inlined_call_operand.hbm [shape: f32[8,256], index: 0, kind: input, shape index: {}]   ;;  %s127_s1 = inlined_call_operand.hbm [shape: f32[8,256], index: 1, kind: output, shape index: {}]  }
   0x1   :  { %7 = vsyncpa [#allocation4], 0  ;;  %s90_s6 = smov [#allocation2]   ;;  %s42_s10 = scalar_lea.hbm %s126_s0, 256 }
   0x2   :  { %s14_s7 = sshll.u32 %s90_s6, 4  ;;  %p43_p0 = scmp.ne.s32.totalorder %s126_s0, %s42_s10  ;;  %s15_s7 = int_to_ptr.vmem [resolvable:$true] %s14_s7 }
   0x3   :  { %p46_p1 = scmp.lt.u32.totalorder %s42_s10, %s126_s0 }
   0x5   :  { %p48_p2 = pnand %p46_p1, %p43_p0 }
   0x7   :  { %51 = shalt.err (!%p48_p2)
}
   0x8   :  { %s52_s15 = scalar_lea.vmem %s15_s7, 256  ;;  %p57_p4 = scmp.lt.s32.totalorder %s15_s7, %s15_s7 }
   0x9   :  { %p53_p3 = scmp.ne.s32.totalorder %s15_s7, %s52_s15  ;;  %p58_p5 = scmp.lt.s32.totalorder %s52_s15, %s52_s15 }
   0xb   :  { %p59_p6 = por %p58_p5, %p57_p4 }
   0xd   :  { %p60_p7 = pnand %p59_p6, %p53_p3 }
   0xf   :  { %63 = shalt.err (!%p60_p7)
}
  0x10   :  { %17 = dma.hbm_to_vmem [thread:$0]  %s126_s0, 256, %s15_s7, [#allocation3]  }
  0x11   :  { %86 = dma.done.wait [#allocation3], 256  }
  0x12   :  { %87 = vsyncadd [#allocation3], 4294967040  ;;  %s91_s18 = smov [#allocation5]   ;;  %v21_v0 = vld [vmem:[#allocation2] sm:$0xff]  ;;  %v22_v1 = vld [vmem:[#allocation2 + $0x8] sm:$0xff] }
  0x13   :  { %s31_s19 = sshll.u32 %s91_s18, 4  ;;  %23 = vst [vmem:[#allocation5] sm:$0xff] %v21_v0  ;;  %24 = vst [vmem:[#allocation5 + $0x8] sm:$0xff] %v22_v1  ;;  %s32_s19 = int_to_ptr.vmem [resolvable:$true] %s31_s19 }
  0x14   :  { %s64_s20 = scalar_lea.vmem %s32_s19, 256  ;;  %p69_p9 = scmp.lt.s32.totalorder %s32_s19, %s32_s19 }
  0x15   :  { %p65_p8 = scmp.ne.s32.totalorder %s32_s19, %s64_s20  ;;  %p70_p10 = scmp.lt.s32.totalorder %s64_s20, %s64_s20 }
  0x17   :  { %p71_p11 = por %p70_p10, %p69_p9 }
  0x19   :  { %p72_p12 = pnand %p71_p11, %p65_p8 }
  0x1b   :  { %75 = shalt.err (!%p72_p12)
}
  0x1c   :  { %s76_s0 = scalar_lea.hbm %s127_s1, 256 }
  0x1d   :  { %p77_p13 = scmp.ne.s32.totalorder %s127_s1, %s76_s0  ;;  %p80_p0 = scmp.lt.u32.totalorder %s76_s0, %s127_s1 }
  0x1f   :  { %p82_p1 = pnand %p80_p0, %p77_p13 }
  0x21   :  { %85 = shalt.err (!%p82_p1)
}
  0x22   :  { %34 = dma.vmem_to_hbm [thread:$0]  %s32_s19, 256, %s127_s1, [#allocation4]  }
  0x23   :  { %88 = dma.done.wait [#allocation4], 256  }
  0x24   :  { %89 = vsyncadd [#allocation4], 4294967040 }
  0x25   :  { %38 = vsyncpa [#allocation3], 1 }
  0x26   :  { %39 = vsyncpa [#allocation4], 1 }

</bundles_post_ra>
